<compile_context>
chip_gen: v7x
topology: tpu7x:2x2x1
jax: 0.10.0
libtpu: 0.0.40
codegen_flags: <defaults>
</compile_context>

<pallas_src>
import jax
import jax.numpy as jnp
from jax.experimental import pallas as pl
from jax.experimental.pallas import tpu as pltpu

IN_FEATURES = 28 * 28    # 784
HIDDEN = 128
OUT_FEATURES = 10
OUT_PADDED = 128         # lane-dense padded logits width (multiple of 128)


def mlp_kernel(x_ref, w1_ref, b1_ref, w2_ref, b2_ref, o_ref):
    # x_ref:  [TB, 784]   compute dtype (bf16 default, or f32)
    # w1_ref: [784, 128]  compute dtype          (VMEM-resident)
    # b1_ref: [1, 128]    f32                    (VMEM-resident)
    # w2_ref: [128, 128]  compute dtype, cols 10..127 zero  (VMEM-resident)
    # b2_ref: [1, 128]    f32, cols 10..127 zero             (VMEM-resident)
    # o_ref:  [TB, 128]   bf16 (lane-dense, unmasked full-lane stores)
    h = jnp.dot(x_ref[...], w1_ref[...], preferred_element_type=jnp.float32)  # MXU, f32 acc
    h = jnp.maximum(h + b1_ref[...], 0.0)                                     # bias + ReLU in f32 (VPU)
    h = h.astype(w2_ref.dtype)
    out = jnp.dot(h, w2_ref[...], preferred_element_type=jnp.float32)         # MXU, f32 acc
    o_ref[...] = (out + b2_ref[...]).astype(o_ref.dtype)                      # bf16 writeback


def pack_params(w1, b1, w2, b2, compute_dtype=jnp.bfloat16):
    """One-time weight packing -- call OUTSIDE the per-request path.

    Transposes torch-layout (out, in) -> (in, out), zero-pads the second layer
    to a lane-dense 128-wide output, and casts matmul operands to the compute
    dtype.  bf16 is the default (the kernel is HBM-bound everywhere and keeps
    f32 accumulation); use jnp.float32 only for a tight-tolerance validation
    path.  On v7x, fp8 for x/w1 is a further option if accuracy allows.
    """
    w1t = jnp.asarray(w1).T.astype(compute_dtype)                       # [784, 128]
    b1r = jnp.asarray(b1, jnp.float32).reshape(1, HIDDEN)               # [1, 128]
    w2t = jnp.zeros((HIDDEN, OUT_PADDED), compute_dtype)
    w2t = w2t.at[:, :OUT_FEATURES].set(jnp.asarray(w2).T.astype(compute_dtype))
    b2r = jnp.zeros((1, OUT_PADDED), jnp.float32)
    b2r = b2r.at[:, :OUT_FEATURES].set(jnp.asarray(b2, jnp.float32))
    return w1t, b1r, w2t, b2r


def _round_up(n, m):
    return (n + m - 1) // m * m


def simple_nn_forward(x, w1t, b1r, w2t, b2r, block_b=1024, return_padded=False):
    """x: [..., 784-elements-total per row], e.g. [B, 1, 28, 28] or [B, 784],
    ideally ALREADY in the compute dtype (w1t.dtype) so no extra HBM pass is
    added.  (w1t, b1r, w2t, b2r) from pack_params.

    Returns logits [B, 10] in bf16, or the padded [B, 128] bf16 slab if
    return_padded=True (lets a downstream consumer fuse/defer the slice).

    block_b: batch rows per grid step.  1024 is near the HBM roofline on
    v5e/v6e; raise to 2048 on v7x for a further 10-30% (still well inside the
    explicit 32 MiB VMEM limit below).
    """
    compute_dtype = w1t.dtype
    x2d = x.reshape(-1, IN_FEATURES)                 # == x.view(-1, 784); free metadata change
    if x2d.dtype != compute_dtype:
        # Extra HBM pass -- upstream should hand us x already in compute dtype.
        x2d = x2d.astype(compute_dtype)
    B = x2d.shape[0]

    # Batch tile: multiple of 8 (sublane), capped at block_b, and clamped so
    # large batches get >= 2 grid steps (the "parallel" batch axis then shards
    # across both v7x TensorCores instead of leaving one idle).
    tb = max(8, min(block_b, _round_up(pl.cdiv(B, 2), 8)))
    grid = (pl.cdiv(B, tb),)                         # ragged last tile; store is masked

    elem = jnp.dtype(compute_dtype).itemsize
    cost = pl.CostEstimate(
        flops=2 * B * IN_FEATURES * HIDDEN + 2 * B * HIDDEN * OUT_PADDED,
        transcendentals=0,
        bytes_accessed=(B * IN_FEATURES * elem            # x
                        + IN_FEATURES * HIDDEN * elem     # w1
                        + HIDDEN * OUT_PADDED * elem      # w2
                        + (HIDDEN + OUT_PADDED) * 4       # biases (f32)
                        + B * OUT_PADDED * 2),            # out (bf16)
    )

    out_padded = pl.pallas_call(
        mlp_kernel,
        out_shape=jax.ShapeDtypeStruct((B, OUT_PADDED), jnp.bfloat16),
        grid=grid,
        in_specs=[
            pl.BlockSpec((tb, IN_FEATURES), lambda i: (i, 0)),       # x: pipelined batch tiles
            pl.BlockSpec((IN_FEATURES, HIDDEN), lambda i: (0, 0)),   # w1: VMEM-resident
            pl.BlockSpec((1, HIDDEN), lambda i: (0, 0)),             # b1: VMEM-resident
            pl.BlockSpec((HIDDEN, OUT_PADDED), lambda i: (0, 0)),    # w2 (padded): VMEM-resident
            pl.BlockSpec((1, OUT_PADDED), lambda i: (0, 0)),         # b2 (padded): VMEM-resident
        ],
        out_specs=pl.BlockSpec((tb, OUT_PADDED), lambda i: (i, 0)),
        compiler_params=pltpu.CompilerParams(
            dimension_semantics=("parallel",),     # shard batch axis across TCs on v7x
            vmem_limit_bytes=32 * 1024 * 1024,     # explicit: safe for tb<=2048 even on v5e
        ),
        cost_estimate=cost,
    )(x2d, w1t, b1r, w2t, b2r)

    if return_padded:
        return out_padded                          # cols 10..127 are exactly 0
    return out_padded[:, :OUT_FEATURES]


def init_params(key):
    """Deterministic init mimicking torch.nn.Linear default
    (uniform(-1/sqrt(fan_in), 1/sqrt(fan_in)))."""
    k1, k2, k3, k4 = jax.random.split(key, 4)
    bound1 = 1.0 / jnp.sqrt(IN_FEATURES)
    w1 = jax.random.uniform(k1, (HIDDEN, IN_FEATURES), jnp.float32, -bound1, bound1)
    b1 = jax.random.uniform(k2, (HIDDEN,), jnp.float32, -bound1, bound1)
    bound2 = 1.0 / jnp.sqrt(HIDDEN)
    w2 = jax.random.uniform(k3, (OUT_FEATURES, HIDDEN), jnp.float32, -bound2, bound2)
    b2 = jax.random.uniform(k4, (OUT_FEATURES,), jnp.float32, -bound2, bound2)
    return w1, b1, w2, b2


if __name__ == "__main__":
    key = jax.random.PRNGKey(0)
    kx, kp = jax.random.split(key)

    # Small MNIST-like batch, NCHW.  x is produced directly in bf16 -- the
    # recommended serving path hands the kernel x already in the compute dtype
    # so the wrapper adds no conversion/pad HBM pass.
    B = 8
    x = jax.random.normal(kx, (B, 1, 28, 28), jnp.bfloat16)
    w1, b1, w2, b2 = init_params(kp)

    # One-time packing outside the per-call path (bf16 streaming by default).
    packed = pack_params(w1, b1, w2, b2, compute_dtype=jnp.bfloat16)

    out = simple_nn_forward(x, *packed)
    out = jax.block_until_ready(out)

    # Pure-JAX f32 reference of the same math on the same (bf16-quantized)
    # input; bf16 matmul operands + bf16 output store => loose tolerance.
    x2d = x.reshape(B, IN_FEATURES).astype(jnp.float32)
    ref = jnp.maximum(x2d @ w1.T + b1, 0.0) @ w2.T + b2
    assert out.shape == (B, OUT_FEATURES)
    assert jnp.allclose(out.astype(jnp.float32), ref, atol=5e-2, rtol=5e-2), (
        jnp.max(jnp.abs(out.astype(jnp.float32) - ref)))

    print("KERNEL_OK")
</pallas_src>

<mosaic_0001>
module attributes {stable_mosaic.version = 11 : i64} {
  func.func @mlp_kernel(%arg0: i32, %arg1: memref<8x784xbf16, #tpu.memory_space<vmem>>, %arg2: memref<784x128xbf16, #tpu.memory_space<vmem>>, %arg3: memref<1x128xf32, #tpu.memory_space<vmem>>, %arg4: memref<128x128xbf16, #tpu.memory_space<vmem>>, %arg5: memref<1x128xf32, #tpu.memory_space<vmem>>, %arg6: memref<8x128xbf16, #tpu.memory_space<vmem>>) attributes {dimension_semantics = [#tpu.dimension_semantics<parallel>], iteration_bounds = array<i64: 1>, scalar_prefetch = 0 : i64, scratch_operands = 0 : i64, tpu.core_type = #tpu.core_type<tc>, window_params = [{transform_indices = @transform_0, window_bounds = array<i64: 8, 784>}, {pipeline_mode = #tpu.pipeline_mode<synchronous>, transform_indices = @transform_1, window_bounds = array<i64: 784, 128>}, {pipeline_mode = #tpu.pipeline_mode<synchronous>, transform_indices = @transform_2, window_bounds = array<i64: 1, 128>}, {pipeline_mode = #tpu.pipeline_mode<synchronous>, transform_indices = @transform_3, window_bounds = array<i64: 128, 128>}, {pipeline_mode = #tpu.pipeline_mode<synchronous>, transform_indices = @transform_4, window_bounds = array<i64: 1, 128>}, {transform_indices = @transform_5, window_bounds = array<i64: 8, 128>}]} {
    %c0 = arith.constant 0 : index
    %c0_0 = arith.constant 0 : index
    %0 = vector.load %arg1[%c0, %c0_0] : memref<8x784xbf16, #tpu.memory_space<vmem>>, vector<8x784xbf16>
    %c0_1 = arith.constant 0 : index
    %c0_2 = arith.constant 0 : index
    %1 = vector.load %arg2[%c0_1, %c0_2] : memref<784x128xbf16, #tpu.memory_space<vmem>>, vector<784x128xbf16>
    %cst = arith.constant dense<0.000000e+00> : vector<8x128xf32>
    %2 = tpu.matmul %0, %1, %cst {dimension_numbers = #tpu.dot_dimension_numbers<[1], [0], [0], [1], [0, 0, 1, 1], [], []>} : vector<8x784xbf16>, vector<784x128xbf16>, vector<8x128xf32> -> vector<8x128xf32>
    %c0_3 = arith.constant 0 : index
    %c0_4 = arith.constant 0 : index
    %3 = vector.load %arg3[%c0_3, %c0_4] : memref<1x128xf32, #tpu.memory_space<vmem>>, vector<1x128xf32>
    %4 = vector.broadcast %3 : vector<1x128xf32> to vector<8x128xf32>
    %5 = arith.addf %2, %4 : vector<8x128xf32>
    %cst_5 = arith.constant 0.000000e+00 : f32
    %6 = vector.broadcast %cst_5 : f32 to vector<8x128xf32>
    %7 = arith.maximumf %5, %6 : vector<8x128xf32>
    %8 = arith.truncf %7 : vector<8x128xf32> to vector<8x128xbf16>
    %c0_6 = arith.constant 0 : index
    %c0_7 = arith.constant 0 : index
    %9 = vector.load %arg4[%c0_6, %c0_7] : memref<128x128xbf16, #tpu.memory_space<vmem>>, vector<128x128xbf16>
    %cst_8 = arith.constant dense<0.000000e+00> : vector<8x128xf32>
    %10 = tpu.matmul %8, %9, %cst_8 {dimension_numbers = #tpu.dot_dimension_numbers<[1], [0], [0], [1], [0, 0, 1, 1], [], []>} : vector<8x128xbf16>, vector<128x128xbf16>, vector<8x128xf32> -> vector<8x128xf32>
    %c0_9 = arith.constant 0 : index
    %c0_10 = arith.constant 0 : index
    %11 = vector.load %arg5[%c0_9, %c0_10] : memref<1x128xf32, #tpu.memory_space<vmem>>, vector<1x128xf32>
    %12 = vector.broadcast %11 : vector<1x128xf32> to vector<8x128xf32>
    %13 = arith.addf %10, %12 : vector<8x128xf32>
    %14 = arith.truncf %13 : vector<8x128xf32> to vector<8x128xbf16>
    %c0_11 = arith.constant 0 : index
    %c0_12 = arith.constant 0 : index
    %15 = vector.load %arg6[%c0_11, %c0_12] : memref<8x128xbf16, #tpu.memory_space<vmem>>, vector<8x128xbf16>
    tpu.vector_store %arg6[%c0_11, %c0_12], %14 {strides = array<i32>} : memref<8x128xbf16, #tpu.memory_space<vmem>>, vector<8x128xbf16>,
    return
  }
  func.func @transform_0(%arg0: i32) -> (i32, i32) {
    %c0_i32 = arith.constant 0 : i32
    %c0_i32_0 = arith.constant 0 : i32
    return %arg0, %c0_i32 : i32, i32
  }
  func.func @transform_1(%arg0: i32) -> (i32, i32) {
    %c0_i32 = arith.constant 0 : i32
    %c0_i32_0 = arith.constant 0 : i32
    %c0_i32_1 = arith.constant 0 : i32
    return %c0_i32, %c0_i32_0 : i32, i32
  }
  func.func @transform_2(%arg0: i32) -> (i32, i32) {
    %c0_i32 = arith.constant 0 : i32
    %c0_i32_0 = arith.constant 0 : i32
    %c0_i32_1 = arith.constant 0 : i32
    return %c0_i32, %c0_i32_0 : i32, i32
  }
  func.func @transform_3(%arg0: i32) -> (i32, i32) {
    %c0_i32 = arith.constant 0 : i32
    %c0_i32_0 = arith.constant 0 : i32
    %c0_i32_1 = arith.constant 0 : i32
    return %c0_i32, %c0_i32_0 : i32, i32
  }
  func.func @transform_4(%arg0: i32) -> (i32, i32) {
    %c0_i32 = arith.constant 0 : i32
    %c0_i32_0 = arith.constant 0 : i32
    %c0_i32_1 = arith.constant 0 : i32
    return %c0_i32, %c0_i32_0 : i32, i32
  }
  func.func @transform_5(%arg0: i32) -> (i32, i32) {
    %c0_i32 = arith.constant 0 : i32
    %c0_i32_0 = arith.constant 0 : i32
    return %arg0, %c0_i32 : i32, i32
  }
}

</mosaic_0001>

<bundles_post_ra>
// kernel: tpu_custom_call.1
= control target key start
LH: loop header
LB: loop body
LE: loop exit
PB: predicated region body
PF: predicated region fallthrough
CT: control target
= control target key end

     0   :  { %10 = vsyncpa [#allocation3], 0  ;;  %s1219_s0 = inlined_call_operand.hbm [shape: bf16[8,784], index: 0, kind: input, shape index: {}]   ;;  %s1220_s1 = inlined_call_operand.hbm [shape: bf16[784,128], index: 1, kind: input, shape index: {}]   ;;  %s1221_s2 = inlined_call_operand.vmem [shape: f32[1,128], index: 2, kind: input, shape index: {}]   ;;  %s1222_s3 = inlined_call_operand.hbm [shape: bf16[128,128], index: 3, kind: input, shape index: {}]   ;;  %s1223_s4 = inlined_call_operand.vmem [shape: f32[1,128], index: 4, kind: input, shape index: {}]   ;;  %s1224_s5 = inlined_call_operand.hbm [shape: bf16[8,128], index: 5, kind: output, shape index: {}]  }
   0x1   :  { %11 = vsyncpa [#allocation6], 0 }
   0x2   :  { %12 = vsyncpa [#allocation4], 0  ;;  %s1119_s18 = smov [#allocation5]   ;;  %s1025_s22 = scalar_lea.hbm %s1220_s1, 6272 }
   0x3   :  { %s28_s19 = sshll.u32 %s1119_s18, 4  ;;  %p1026_p0 = scmp.ne.s32.totalorder %s1220_s1, %s1025_s22  ;;  %s29_s19 = int_to_ptr.vmem [resolvable:$true] %s28_s19 }
   0x4   :  { %p1029_p1 = scmp.lt.u32.totalorder %s1025_s22, %s1220_s1 }
   0x6   :  { %p1031_p2 = pnand %p1029_p1, %p1026_p0 }
   0x8   :  { %1034 = shalt.err (!%p1031_p2)
}
   0x9   :  { %s1035_s27 = scalar_lea.vmem %s29_s19, 6272  ;;  %p1040_p4 = scmp.lt.s32.totalorder %s29_s19, %s29_s19 }
   0xa   :  { %p1036_p3 = scmp.ne.s32.totalorder %s29_s19, %s1035_s27  ;;  %p1041_p5 = scmp.lt.s32.totalorder %s1035_s27, %s1035_s27 }
   0xc   :  { %p1042_p6 = por %p1041_p5, %p1040_p4 }
   0xe   :  { %p1043_p7 = pnand %p1042_p6, %p1036_p3 }
  0x10   :  { %1046 = shalt.err (!%p1043_p7)
}
  0x11   :  { %s1120_s28 = smov 64   ;;  %s1121_s29 = smov 4  }
  0x12   :  { %34 = dma.hbm_to_vmem [thread:$0]  %s1220_s1, 6272, %s29_s19, [#allocation6], %s1120_s28, %s1120_s28, %s1121_s29  }
  0x13   :  { %s1122_s7 = smov [#allocation2]   ;;  %s1123_s9 = smov [#allocation7]  }
  0x14   :  { %s19_s8 = sshll.u32 %s1122_s7, 4  ;;  %s42_s10 = sshll.u32 %s1123_s9, 4  ;;  %s20_s8 = int_to_ptr.vmem [resolvable:$true] %s19_s8  ;;  %s43_s10 = int_to_ptr.vmem [resolvable:$true] %s42_s10 }
  0x15   :  { %s1047_s13 = scalar_lea.hbm %s1219_s0, 448 }
  0x16   :  { %p1048_p8 = scmp.ne.s32.totalorder %s1219_s0, %s1047_s13  ;;  %p1051_p9 = scmp.lt.u32.totalorder %s1047_s13, %s1219_s0 }
  0x18   :  { %p1053_p10 = pnand %p1051_p9, %p1048_p8 }
  0x1a   :  { %1056 = shalt.err (!%p1053_p10)
}
  0x1b   :  { %s1057_s1 = scalar_lea.vmem %s20_s8, 448  ;;  %p1062_p12 = scmp.lt.s32.totalorder %s20_s8, %s20_s8 }
  0x1c   :  { %p1058_p11 = scmp.ne.s32.totalorder %s20_s8, %s1057_s1  ;;  %p1063_p13 = scmp.lt.s32.totalorder %s1057_s1, %s1057_s1 }
  0x1e   :  { %p1064_p0 = por %p1063_p13, %p1062_p12 }
  0x20   :  { %p1065_p1 = pnand %p1064_p0, %p1058_p11 }
  0x22   :  { %1068 = shalt.err (!%p1065_p1)
}
  0x23   :  { %22 = dma.hbm_to_vmem [thread:$0]  %s1219_s0, 448, %s20_s8, [#allocation3]  }
  0x24   :  { %s1069_s22 = scalar_lea.hbm %s1222_s3, 1024 }
  0x25   :  { %p1070_p2 = scmp.ne.s32.totalorder %s1222_s3, %s1069_s22  ;;  %p1073_p3 = scmp.lt.u32.totalorder %s1069_s22, %s1222_s3 }
  0x27   :  { %p1075_p4 = pnand %p1073_p3, %p1070_p2 }
  0x29   :  { %1078 = shalt.err (!%p1075_p4)
}
  0x2a   :  { %s1079_s27 = scalar_lea.vmem %s43_s10, 1024  ;;  %p1084_p6 = scmp.lt.s32.totalorder %s43_s10, %s43_s10 }
  0x2b   :  { %p1080_p5 = scmp.ne.s32.totalorder %s43_s10, %s1079_s27  ;;  %p1085_p7 = scmp.lt.s32.totalorder %s1079_s27, %s1079_s27 }
  0x2d   :  { %p1086_p8 = por %p1085_p7, %p1084_p6 }
  0x2f   :  { %p1087_p9 = pnand %p1086_p8, %p1080_p5 }
  0x31   :  { %1090 = shalt.err (!%p1087_p9)
}
  0x32   :  { %48 = dma.hbm_to_vmem [thread:$0]  %s1222_s3, 1024, %s43_s10, [#allocation6], %s1120_s28, %s1120_s28, %s1121_s29  }
  0x33   :  { %1113 = dma.done.wait [#allocation3], 448  }
  0x34   :  { %1114 = vsyncadd [#allocation3], 4294966848 }
  0x35   :  { %1115 = dma.done.wait [#allocation6], 7296  }
  0x36   :  { %1116 = vsyncadd [#allocation6], 4294960000  ;;  %v961_v0 = vld [vmem:[#allocation5 + $0x40] sm:$0xff]   ;;  %v965_v4 = vld [vmem:[#allocation5 + $0x48] sm:$0xff]   ;;  %v1124_v43 = vmov 0.0   ;;  %vm1125_vm0 = vmmov 0  }
  0x37   :  { %v962_v1 = vld [vmem:[#allocation5] sm:$0xff]   ;;  %850 = vmatprep.subr.bf16.mxu0 %v961_v0  ;;  %v966_v5 = vld [vmem:[#allocation5 + $0x8] sm:$0xff]   ;;  %v969_v8 = vld [vmem:[#allocation5 + $0x50] sm:$0xff]   ;;  %vm488_vm1 = vcmask 130048   ;;  %s1126_s6 = smov [#allocation8]  }
  0x38   :  { %v963_v2 = vld [vmem:[#allocation5 + $0xc0] sm:$0xff]   ;;  %851 = vmatpush3.bf16.msra.mxu0 %v962_v1  ;;  %v967_v6 = vld [vmem:[#allocation5 + $0xc8] sm:$0xff]   ;;  %v970_v9 = vld [vmem:[#allocation5 + $0x10] sm:$0xff]   ;;  %s773_s7 = sshll.u32 %s1126_s6, 4  ;;  %s774_s7 = int_to_ptr.vmem [resolvable:$true] %s773_s7 }
  0x39   :  { %v964_v3 = vld [vmem:[#allocation5 + $0x80] sm:$0xff]   ;;  %872 = vmatprep.subr.bf16.mxu1 %v963_v2  ;;  %852 = vmatprep.subr.bf16.mxu0 %v965_v4  ;;  %v968_v7 = vld [vmem:[#allocation5 + $0x88] sm:$0xff]   ;;  %v971_v10 = vld [vmem:[#allocation5 + $0xd0] sm:$0xff]   ;;  %s1091_s8 = scalar_lea.vmem %s774_s7, 64  ;;  %p1096_p11 = scmp.lt.s32.totalorder %s774_s7, %s774_s7 }
  0x3a   :  { %873 = vmatpush3.bf16.msra.mxu1 %v964_v3  ;;  %v972_v11 = vld [vmem:[#allocation5 + $0x90] sm:$0xff]   ;;  %v973_v12 = vld [vmem:[#allocation5 + $0x58] sm:$0xff]   ;;  %v977_v16 = vld [vmem:[#allocation5 + $0x60] sm:$0xff]   ;;  %p1092_p10 = scmp.ne.s32.totalorder %s774_s7, %s1091_s8  ;;  %p1097_p12 = scmp.lt.s32.totalorder %s1091_s8, %s1091_s8 }
  0x3b   :  { %874 = vmatprep.subr.bf16.mxu1 %v967_v6  ;;  %v974_v13 = vld [vmem:[#allocation5 + $0x18] sm:$0xff]   ;;  %v978_v17 = vld [vmem:[#allocation5 + $0x20] sm:$0xff]   ;;  %v981_v20 = vld [vmem:[#allocation5 + $0x68] sm:$0xff]  }
  0x3c   :  { %853 = vmatpush3.bf16.msra.mxu0 %v966_v5  ;;  %v975_v14 = vld [vmem:[#allocation5 + $0xd8] sm:$0xff]   ;;  %v979_v18 = vld [vmem:[#allocation5 + $0xe0] sm:$0xff]   ;;  %v982_v21 = vld [vmem:[#allocation5 + $0x28] sm:$0xff]   ;;  %p1098_p13 = por %p1097_p12, %p1096_p11 }
  0x3d   :  { %854 = vmatprep.subr.bf16.mxu0 %v969_v8  ;;  %v976_v15 = vld [vmem:[#allocation5 + $0x98] sm:$0xff]   ;;  %v980_v19 = vld [vmem:[#allocation5 + $0xa0] sm:$0xff]   ;;  %v983_v22 = vld [vmem:[#allocation5 + $0xe8] sm:$0xff]  }
  0x3e   :  { %875 = vmatpush3.bf16.msra.mxu1 %v968_v7  ;;  %v984_v23 = vld [vmem:[#allocation5 + $0xa8] sm:$0xff]   ;;  %v985_v24 = vld [vmem:[#allocation5 + $0x70] sm:$0xff]   ;;  %v989_v28 = vld [vmem:[#allocation5 + $0x78] sm:$0xff]   ;;  %p1099_p0 = pnand %p1098_p13, %p1092_p10 }
  0x3f   :  { %876 = vmatprep.subr.bf16.mxu1 %v971_v10  ;;  %v986_v25 = vld [vmem:[#allocation5 + $0x30] sm:$0xff]   ;;  %v990_v29 = vld [vmem:[#allocation5 + $0x38] sm:$0xff]   ;;  %v61_v31 = vld [vmem:[#allocation2] sm:$0xff] }
  0x40   :  { %855 = vmatpush3.bf16.msra.mxu0 %v970_v9  ;;  %v987_v26 = vld [vmem:[#allocation5 + $0xf0] sm:$0xff]   ;;  %v991_v30 = vld [vmem:[#allocation5 + $0xf8] sm:$0xff]   ;;  %v784_v32 = vcombine.low %v61_v31, %v61_v31  ;;  %v785_v33 = vcombine.high %v61_v31, %v61_v31  ;;  %v995_v35 = vld [vmem:[#allocation5 + $0x140] sm:$0xff]  }
  0x41   :  { %856 = vmatprep.subr.bf16.mxu0 %v973_v12  ;;  %v988_v27 = vld [vmem:[#allocation5 + $0xb0] sm:$0xff]   ;;  %v994_v34 = vld [vmem:[#allocation5 + $0xb8] sm:$0xff]   ;;  %v998_v39 = vld [vmem:[#allocation5 + $0x100] sm:$0xff]  }
  0x42   :  { %877 = vmatpush3.bf16.msra.mxu1 %v972_v11  ;;  %v62_v36 = vld [vmem:[#allocation2 + $0x8] sm:$0xff]  ;;  %524 = vmatprep.mubr.bf16.mxu0 %v785_v33  ;;  %v1003_v45 = vld [vmem:[#allocation5 + $0x158] sm:$0xff]   ;;  %v1005_v47 = vld [vmem:[#allocation5 + $0x160] sm:$0xff]  }
  0x43   :  { %878 = vmatprep.subr.bf16.mxu1 %v975_v14  ;;  %v786_v37 = vcombine.low %v62_v36, %v62_v36  ;;  %v787_v38 = vcombine.high %v62_v36, %v62_v36  ;;  %v999_v40 = vld [vmem:[#allocation5 + $0x148] sm:$0xff]   ;;  %v1001_v42 = vld [vmem:[#allocation5 + $0x150] sm:$0xff]   ;;  %v1004_v46 = vld [vmem:[#allocation5 + $0x118] sm:$0xff]  }
  0x44   :  { %857 = vmatpush3.bf16.msra.mxu0 %v974_v13  ;;  %v1000_v41 = vld [vmem:[#allocation5 + $0x108] sm:$0xff]   ;;  %v1002_v44 = vld [vmem:[#allocation5 + $0x110] sm:$0xff]   ;;  %v1006_v48 = vld [vmem:[#allocation5 + $0x120] sm:$0xff]  }
  0x45   :  { %858 = vmatprep.subr.bf16.mxu0 %v977_v16  ;;  %564 = vmatprep.mubr.bf16.mxu1 %v787_v38  ;;  %v1007_v49 = vld [vmem:[#allocation5 + $0x168] sm:$0xff]   ;;  %v1013_v50 = vld [vmem:[#allocation5 + $0x180] sm:$0xff]   ;;  %v63_v51 = vld [vmem:[#allocation2 + $0x10] sm:$0xff] }
  0x46   :  { %879 = vmatpush3.bf16.msra.mxu1 %v976_v15  ;;  %v1008_v52 = vld [vmem:[#allocation5 + $0x128] sm:$0xff]   ;;  %v789_v53 = vcombine.high %v63_v51, %v63_v51  ;;  %v1016_v54 = vld [vmem:[#allocation2 + $0x18] ss:$0 sps:$4 sm:$0xff]   ;;  %v1009_v55 = vld [vmem:[#allocation5 + $0x170] sm:$0xff]   ;;  %v788_v59 = vcombine.low %v63_v51, %v63_v51 }
  0x47   :  { %880 = vmatprep.subr.bf16.mxu1 %v979_v18  ;;  %v1010_v56 = vld [vmem:[#allocation5 + $0x130] sm:$0xff]   ;;  %v1011_v57 = vld [vmem:[#allocation5 + $0x178] sm:$0xff]   ;;  %v1017_v60 = vld [vmem:[#allocation7] sm:$0xff]  }
  0x48   :  { %859 = vmatpush3.bf16.msra.mxu0 %v978_v17  ;;  %v1012_v58 = vld [vmem:[#allocation5 + $0x138] sm:$0xff]   ;;  %v1018_v61 = vld [vmem:[#allocation7 + $0x8] sm:$0xff]   ;;  %v1020_v63 = vld [vmem:[#allocation7 + $0x18] sm:$0xff]  }
  0x49   :  { %860 = vmatprep.subr.bf16.mxu0 %v981_v20  ;;  %v1019_v62 = vld [vmem:[#allocation7 + $0x10] sm:$0xff]   ;;  %v1021_v0 = vld [vmem:[#allocation7 + $0x20] sm:$0xff]   ;;  %v1022_v1 = vld [vmem:[#allocation7 + $0x28] sm:$0xff]  }
  0x4a   :  { %881 = vmatpush3.bf16.msra.mxu1 %v980_v19  ;;  %v1023_v2 = vld [vmem:[#allocation7 + $0x30] sm:$0xff]   ;;  %v1024_v3 = vld [vmem:[#allocation7 + $0x38] sm:$0xff]  }
  0x4b   :  { %882 = vmatprep.subr.bf16.mxu1 %v983_v22  ;;  %v783_v5 = vld [vmem:[%s1221_s2] ss:$0 sm:$0xff] }
  0x4c   :  { %861 = vmatpush3.bf16.msra.mxu0 %v982_v21 }
  0x4d   :  { %862 = vmatprep.subr.bf16.mxu0 %v985_v24 }
  0x4e   :  { %883 = vmatpush3.bf16.msra.mxu1 %v984_v23 }
  0x4f   :  { %884 = vmatprep.subr.bf16.mxu1 %v987_v26 }
  0x50   :  { %863 = vmatpush3.bf16.msra.mxu0 %v986_v25 }
  0x51   :  { %864 = vmatprep.subr.bf16.mxu0 %v989_v28 }
  0x52   :  { %885 = vmatpush3.bf16.msra.mxu1 %v988_v27 }
  0x53   :  { %886 = vmatprep.subr.bf16.mxu1 %v991_v30  ;;  %v841_v30 = vld [vmem:[%s1223_s4] ss:$0 sm:$0xff] }
  0x54   :  { %865 = vmatpush3.bf16.msra.mxu0 %v990_v29 }
  0x55   :  { %894 = vmatprep.subr.bf16.mxu0 %v995_v35 }
  0x56   :  { %887 = vmatpush3.bf16.msra.mxu1 %v994_v34 }
  0x57   :  { %525 = vmatmul.mubr.bf16.vlgmr.msra.gmra.mrb[0].mxu0 %v784_v32  ;;  %927 = vmatprep.subr.bf16.mxu1 %v1124_v43 }
  0x58   :  { %895 = vmatpush3.bf16.msra.mxu0 %v998_v39  ;;  %604 = vmatprep.mubr.bf16.mxu0 %v789_v53 }
  0x59   :  { %565 = vmatmul.mubr.bf16.vlgmr.msra.gmra.mrb[0].mxu1 %v786_v37  ;;  %896 = vmatprep.subr.bf16.mxu0 %v999_v40 }
  0x5a   :  { %929 = vmatprep.mubr.msk.bf16.mxu1 %vm1125_vm0, %v1124_v43  ;;  %928 = vmatpush3.bf16.msra.mxu1 %v1013_v50 }
  0x5b   :  { %933 = vmatprep.subr.bf16.mxu1 %v1124_v43 }
  0x5c   :  { %897 = vmatpush3.bf16.msra.mxu0 %v1000_v41 }
  0x5d   :  { %898 = vmatprep.subr.bf16.mxu0 %v1001_v42 }
  0x60   :  { %899 = vmatpush3.bf16.msra.mxu0 %v1002_v44 }
  0x61   :  { %900 = vmatprep.subr.bf16.mxu0 %v1003_v45  ;;  %930 = vmatmul.mubr.msk.bf16.vlgmr.msra.gmra.mrb[4].mxu1 %vm488_vm1, %v1016_v54 }
  0x62   :  { %949 = vmatprep.mubr.msk.bf16.mxu1 %vm1125_vm0, %v1124_v43  ;;  %934 = vmatpush3.bf16.msra.mxu1 %v1017_v60 }
  0x63   :  { %935 = vmatprep.subr.bf16.mxu1 %v1124_v43 }
  0x64   :  { %901 = vmatpush3.bf16.msra.mxu0 %v1004_v46 }
  0x65   :  { %902 = vmatprep.subr.bf16.mxu0 %v1005_v47 }
  0x66   :  { %936 = vmatpush3.bf16.msra.mxu1 %v1018_v61 }
  0x67   :  { %937 = vmatprep.subr.bf16.mxu1 %v1124_v43 }
  0x68   :  { %903 = vmatpush3.bf16.msra.mxu0 %v1006_v48 }
  0x69   :  { %904 = vmatprep.subr.bf16.mxu0 %v1007_v49 }
  0x6a   :  { %938 = vmatpush3.bf16.msra.mxu1 %v1019_v62 }
  0x6b   :  { %939 = vmatprep.subr.bf16.mxu1 %v1124_v43 }
  0x6c   :  { %905 = vmatpush3.bf16.msra.mxu0 %v1008_v52 }
  0x6d   :  { %906 = vmatprep.subr.bf16.mxu0 %v1009_v55 }
  0x6e   :  { %940 = vmatpush3.bf16.msra.mxu1 %v1020_v63 }
  0x6f   :  { %941 = vmatprep.subr.bf16.mxu1 %v1124_v43 }
  0x70   :  { %907 = vmatpush3.bf16.msra.mxu0 %v1010_v56 }
  0x71   :  { %908 = vmatprep.subr.bf16.mxu0 %v1011_v57 }
  0x72   :  { %942 = vmatpush3.bf16.msra.mxu1 %v1021_v0 }
  0x73   :  { %943 = vmatprep.subr.bf16.mxu1 %v1124_v43 }
  0x74   :  { %909 = vmatpush3.bf16.msra.mxu0 %v1012_v58 }
  0x76   :  { %944 = vmatpush3.bf16.msra.mxu1 %v1022_v1 }
  0x77   :  { %605 = vmatmul.mubr.bf16.vlgmr.msra.gmra.mrb[4].mxu0 %v788_v59  ;;  %945 = vmatprep.subr.bf16.mxu1 %v1124_v43 }
  0x7a   :  { %946 = vmatpush3.bf16.msra.mxu1 %v1023_v2 }
  0x7b   :  { %947 = vmatprep.subr.bf16.mxu1 %v1124_v43 }
  0x7e   :  { %948 = vmatpush3.bf16.msra.mxu1 %v1024_v3 }
 0x12a   :  { %v866_v4 = vpop.f32.mrb[0].mxu0 }
 0x12b   :  { %v867_v6 = vpop.f32.mrb[1].mxu0 }
 0x12c   :  { %v868_v7 = vadd.f32 %v867_v6, %v866_v4  ;;  %v869_v8 = vpop.f32.mrb[2].mxu0  ;;  %v888_v9 = vpop.f32.mrb[0].mxu1 }
 0x12d   :  { %v870_v10 = vpop.f32.mrb[3].mxu0  ;;  %v889_v11 = vpop.f32.mrb[1].mxu1 }
 0x12e   :  { %v527_v12 = vadd.f32 %v868_v7, %v783_v5  ;;  %v890_v13 = vadd.f32 %v889_v11, %v888_v9  ;;  %v891_v14 = vpop.f32.mrb[2].mxu1 }
 0x12f   :  { %v892_v15 = vpop.f32.mrb[3].mxu1 }
 0x130   :  { %v567_v16 = vadd.f32 %v890_v13, %v527_v12 }
 0x134   :  { %v646_v17 = vpop.f32.mrb[4].mxu1 }
 0x135   :  { %v931_v18 = vpop.f32.mrb[5].mxu1 }
 0x136   :  { %v649_v19 = vpop.f32.mrb[6].mxu1 }
 0x137   :  { %v932_v20 = vpop.f32.mrb[7].mxu1 }
 0x14a   :  { %v910_v21 = vpop.f32.mrb[4].mxu0 }
 0x14b   :  { %v911_v22 = vpop.f32.mrb[5].mxu0 }
 0x14c   :  { %v912_v23 = vadd.f32 %v911_v22, %v910_v21  ;;  %v913_v24 = vpop.f32.mrb[6].mxu0 }
 0x14d   :  { %v914_v25 = vpop.f32.mrb[7].mxu0 }
 0x14e   :  { %v607_v26 = vadd.f32 %v912_v23, %v567_v16 }
 0x150   :  { %v647_v27 = vadd.f32 %v646_v17, %v607_v26 }
 0x152   :  { %v652_v28 = vmax.f32 %v647_v27, 0.0 }
 0x154   :  { %v653_v29 = vpack.c.bf16 %v652_v28, %v652_v28 }
 0x156   :  { %950 = vmatmul.mubr.bf16.vlgmr.msra.gmra.mrb[8].mxu1 %v653_v29 }
 0x229   :  { %v759_v31 = vpop.f32.mrb[8].mxu1 }
 0x22a   :  { %v760_v32 = vadd.f32 %v841_v30, %v759_v31  ;;  %v951_v33 = vpop.f32.mrb[9].mxu1 }
 0x22b   :  { %v762_v34 = vpop.f32.mrb[10].mxu1 }
 0x22c   :  { %v765_v35 = vpack.c.bf16 %v760_v32, %v760_v32  ;;  %v952_v36 = vpop.f32.mrb[11].mxu1 }
 0x22e   :  { %766 = vst [vmem:[#allocation8] sm:$0xf] %v765_v35 }
 0x22f   :  { %1102 = shalt.err (!%p1099_p0)
}
 0x230   :  { %s1103_s4 = scalar_lea.hbm %s1224_s5, 64 }
 0x231   :  { %p1104_p1 = scmp.ne.s32.totalorder %s1224_s5, %s1103_s4  ;;  %p1107_p2 = scmp.lt.u32.totalorder %s1103_s4, %s1224_s5 }
 0x233   :  { %p1109_p3 = pnand %p1107_p2, %p1104_p1 }
 0x235   :  { %1112 = shalt.err (!%p1109_p3)
}
 0x236   :  { %776 = dma.vmem_to_hbm [thread:$0]  %s774_s7, 64, %s1224_s5, [#allocation4]  }
 0x237   :  { %1117 = dma.done.wait [#allocation4], 64  }
 0x238   :  { %1118 = vsyncadd [#allocation4], 4294967232 }
 0x239   :  { %780 = vsyncpa [#allocation3], 1 }
 0x23a   :  { %781 = vsyncpa [#allocation6], 1 }
 0x23b   :  { %782 = vsyncpa [#allocation4], 1 }

</bundles_post_ra>
